<compile_context>
chip_gen: v6e
topology: v6e:2x2x1
jax: 0.10.0
libtpu: 0.0.40
codegen_flags: <defaults>
</compile_context>

<pallas_src>
import functools

import jax
import jax.numpy as jnp
from jax.experimental import pallas as pl
from jax.experimental.pallas import tpu as pltpu

LANE = 128


def _round_up(n, m):
    return ((n + m - 1) // m) * m


def mlp_kernel(x_ref, w1_ref, b1_ref, w2_ref, b2_ref, w3_ref, b3_ref, o_ref):
    # Layer 1: Linear (bf16 operands -> f32 MXU accumulation) + bias + ReLU (f32 VPU).
    # x is loaded as f32 (narrow-lane tile) and cast to bf16 in vregs; K = input_size.
    x = x_ref[...].astype(jnp.bfloat16)
    h1 = jnp.dot(x, w1_ref[...], preferred_element_type=jnp.float32)
    h1 = jnp.maximum(h1 + b1_ref[...], 0.0)

    # Layer 2: Linear + Dropout(p=0.4) + ReLU.
    # TODO(synk): Dropout is identity (eval-mode forward only); training-mode masking and
    #             1/(1-p) scaling are not implemented in this kernel.
    h2 = jnp.dot(h1.astype(jnp.bfloat16), w2_ref[...], preferred_element_type=jnp.float32)
    h2 = jnp.maximum(h2 + b2_ref[...], 0.0)

    # Output layer: Linear, stored as a lane-dense (block_m, O_p) slab.
    out = jnp.dot(h2.astype(jnp.bfloat16), w3_ref[...], preferred_element_type=jnp.float32)
    o_ref[...] = (out + b3_ref[...]).astype(o_ref.dtype)


def prepare_params(params):
    """One-time: lane-pad hidden/output dims to 128 and pre-cast weights to bf16.

    Returns (padded_params, out_features). Run once at init / weight update, NOT per call.
    Zero padding is exact: padded hidden columns stay 0 through bias+ReLU, padded w rows
    multiply those zeros, padded output columns are 0 and sliced off by the wrapper.
    """
    H1 = params["w1"].shape[1]
    H2 = params["w2"].shape[1]
    O = params["w3"].shape[1]
    H1_p, H2_p, O_p = (_round_up(d, LANE) for d in (H1, H2, O))

    prepped = {
        "w1": jnp.pad(params["w1"], ((0, 0), (0, H1_p - H1))).astype(jnp.bfloat16),
        "b1": jnp.pad(params["b1"], ((0, 0), (0, H1_p - H1))).astype(jnp.float32),
        "w2": jnp.pad(params["w2"], ((0, H1_p - H1), (0, H2_p - H2))).astype(jnp.bfloat16),
        "b2": jnp.pad(params["b2"], ((0, 0), (0, H2_p - H2))).astype(jnp.float32),
        "w3": jnp.pad(params["w3"], ((0, H2_p - H2), (0, O_p - O))).astype(jnp.bfloat16),
        "b3": jnp.pad(params["b3"], ((0, 0), (0, O_p - O))).astype(jnp.float32),
    }
    prepped = jax.tree_util.tree_map(jax.block_until_ready, prepped)
    return prepped, O


@functools.partial(jax.jit, static_argnames=("out_features", "block_m", "out_dtype"))
def mlp_forward(x, params, out_features, *, block_m=None, out_dtype=jnp.float32):
    """x: [B, input_size] float32. params: output of prepare_params()[0] (pre-padded, bf16)."""
    B, F = x.shape
    H1_p = params["w1"].shape[1]
    H2_p = params["w2"].shape[1]
    O_p = params["w3"].shape[1]

    # --- Tile heuristic ---------------------------------------------------------------
    # * multiple of 16 rows (sublane-safe for f32 I/O and bf16 in-kernel operands)
    # * tiny batch: single grid step (whole batch resident, no pipeline overhead)
    # * medium batch: split into >=2 grid steps so v7x's 2 TensorCores both get work
    # * large batch: 512-row tiles (measured ~85% of HBM roofline vs ~63% at 256 rows)
    B_p = _round_up(B, 16)
    if block_m is None:
        if B_p <= 128:
            block_m = B_p
        elif B_p <= 1024:
            block_m = _round_up(-(-B_p // 2), 16)
        else:
            block_m = 512
    else:
        block_m = _round_up(int(block_m), 16)
    B_pad = _round_up(B, block_m)

    # Only the batch dim of x is (possibly) padded; dtype stays f32 (no widening pass).
    x_p = jnp.pad(x, ((0, B_pad - B), (0, 0))) if B_pad != B else x

    grid = (B_pad // block_m,)
    resident = lambda shape: pl.BlockSpec(shape, lambda i: (0, 0))  # weights/biases stay put

    # Explicit VMEM budget (double-buffered I/O tiles + resident weights + headroom)
    # so large block_m never trips v5e's 16 MiB scoped default; capped well under
    # v7x's 64 MiB physical VMEM.
    out_bytes = jnp.dtype(out_dtype).itemsize
    io_bytes = 2 * block_m * (F * 4 + O_p * out_bytes)
    w_bytes = 2 * (2 * (F * H1_p + H1_p * H2_p + H2_p * O_p) + 4 * (H1_p + H2_p + O_p))
    vmem_limit = int(min(max(2 * (io_bytes + w_bytes) + (8 << 20), 16 << 20), 32 << 20))

    out_p = pl.pallas_call(
        mlp_kernel,
        out_shape=jax.ShapeDtypeStruct((B_pad, O_p), out_dtype),
        grid_spec=pltpu.PrefetchScalarGridSpec(
            num_scalar_prefetch=0,
            grid=grid,
            in_specs=[
                pl.BlockSpec((block_m, F), lambda i: (i, 0)),  # x tile: full (unpadded) F
                resident((F, H1_p)),                           # w1 (bf16, pre-padded)
                resident((1, H1_p)),                           # b1
                resident((H1_p, H2_p)),                        # w2
                resident((1, H2_p)),                           # b2
                resident((H2_p, O_p)),                         # w3
                resident((1, O_p)),                            # b3
            ],
            out_specs=pl.BlockSpec((block_m, O_p), lambda i: (i, 0)),
        ),
        compiler_params=pltpu.CompilerParams(
            dimension_semantics=("parallel",),
            vmem_limit_bytes=vmem_limit,
        ),
    )(x_p, params["w1"], params["b1"], params["w2"], params["b2"],
      params["w3"], params["b3"])

    return out_p[:B, :out_features]


def init_params(key, input_size, hidden_units=(64, 64), output_size=6):
    """Deterministic PyTorch-style (uniform +-1/sqrt(fan_in)) init, weights stored [in, out]."""
    dims = [input_size, *hidden_units, output_size]
    params = {}
    keys = jax.random.split(key, 2 * (len(dims) - 1))
    for idx in range(len(dims) - 1):
        fan_in, fan_out = dims[idx], dims[idx + 1]
        bound = 1.0 / jnp.sqrt(float(fan_in))
        wk, bk = keys[2 * idx], keys[2 * idx + 1]
        params[f"w{idx + 1}"] = jax.random.uniform(
            wk, (fan_in, fan_out), jnp.float32, minval=-bound, maxval=bound)
        params[f"b{idx + 1}"] = jax.random.uniform(
            bk, (1, fan_out), jnp.float32, minval=-bound, maxval=bound)
    return params


def mlp_reference(x, params, *, quantize_bf16=True):
    """Pure-JAX reference. With quantize_bf16=True it mirrors the kernel's bf16 operand
    rounding (f32 accumulation), so it should match the kernel very tightly."""
    def q(a):
        return a.astype(jnp.bfloat16).astype(jnp.float32) if quantize_bf16 else a
    h1 = jnp.maximum(jnp.dot(q(x), q(params["w1"])) + params["b1"], 0.0)
    h2 = jnp.maximum(jnp.dot(q(h1), q(params["w2"])) + params["b2"], 0.0)
    return jnp.dot(q(h2), q(params["w3"])) + params["b3"]


if __name__ == "__main__":
    key = jax.random.PRNGKey(0)
    k_param, k_x = jax.random.split(key)

    batch = 16
    input_size = 32
    hidden_units = (64, 64)
    output_size = 6

    params = init_params(k_param, input_size, hidden_units, output_size)
    padded_params, out_features = prepare_params(params)  # one-time pad + bf16 cast

    x = jax.random.normal(k_x, (batch, input_size), jnp.float32)

    out = mlp_forward(x, padded_params, out_features)
    jax.block_until_ready(out)
    assert out.shape == (batch, output_size)

    # Check against the bf16-operand / f32-accumulation reference (tight tolerance) ...
    ref_q = mlp_reference(x, params, quantize_bf16=True)
    assert jnp.allclose(out, ref_q, atol=1e-3, rtol=1e-3), float(jnp.max(jnp.abs(out - ref_q)))
    # ... and against the full-f32 PyTorch-semantics reference (bf16 rounding tolerance).
    ref_f32 = mlp_reference(x, params, quantize_bf16=False)
    assert jnp.allclose(out, ref_f32, atol=3e-2, rtol=3e-2), float(jnp.max(jnp.abs(out - ref_f32)))

    # Also exercise the multi-step / split-grid path (>=2 grid steps, as used on v7x).
    x_big = jax.random.normal(k_x, (300, input_size), jnp.float32)
    out_big = mlp_forward(x_big, padded_params, out_features)
    jax.block_until_ready(out_big)
    ref_big = mlp_reference(x_big, params, quantize_bf16=True)
    assert out_big.shape == (300, output_size)
    assert jnp.allclose(out_big, ref_big, atol=1e-3, rtol=1e-3)

    # predict() equivalent (argmax over class dim) — plain JAX glue.
    preds = jnp.argmax(out, axis=1)
    jax.block_until_ready(preds)

    print("KERNEL_OK")
</pallas_src>

<mosaic_0001>
module attributes {stable_mosaic.version = 11 : i64} {
  func.func @mlp_kernel(%arg0: i32, %arg1: memref<16x32xf32, #tpu.memory_space<vmem>>, %arg2: memref<32x128xbf16, #tpu.memory_space<vmem>>, %arg3: memref<1x128xf32, #tpu.memory_space<vmem>>, %arg4: memref<128x128xbf16, #tpu.memory_space<vmem>>, %arg5: memref<1x128xf32, #tpu.memory_space<vmem>>, %arg6: memref<128x128xbf16, #tpu.memory_space<vmem>>, %arg7: memref<1x128xf32, #tpu.memory_space<vmem>>, %arg8: memref<16x128xf32, #tpu.memory_space<vmem>>) attributes {dimension_semantics = [#tpu.dimension_semantics<parallel>], iteration_bounds = array<i64: 1>, scalar_prefetch = 0 : i64, scratch_operands = 0 : i64, tpu.core_type = #tpu.core_type<tc>, window_params = [{transform_indices = @transform_0, window_bounds = array<i64: 16, 32>}, {pipeline_mode = #tpu.pipeline_mode<synchronous>, transform_indices = @transform_1, window_bounds = array<i64: 32, 128>}, {pipeline_mode = #tpu.pipeline_mode<synchronous>, transform_indices = @transform_2, window_bounds = array<i64: 1, 128>}, {pipeline_mode = #tpu.pipeline_mode<synchronous>, transform_indices = @transform_3, window_bounds = array<i64: 128, 128>}, {pipeline_mode = #tpu.pipeline_mode<synchronous>, transform_indices = @transform_4, window_bounds = array<i64: 1, 128>}, {pipeline_mode = #tpu.pipeline_mode<synchronous>, transform_indices = @transform_5, window_bounds = array<i64: 128, 128>}, {pipeline_mode = #tpu.pipeline_mode<synchronous>, transform_indices = @transform_6, window_bounds = array<i64: 1, 128>}, {transform_indices = @transform_7, window_bounds = array<i64: 16, 128>}]} {
    %c0 = arith.constant 0 : index
    %c0_0 = arith.constant 0 : index
    %0 = vector.load %arg1[%c0, %c0_0] : memref<16x32xf32, #tpu.memory_space<vmem>>, vector<16x32xf32>
    %1 = arith.truncf %0 : vector<16x32xf32> to vector<16x32xbf16>
    %c0_1 = arith.constant 0 : index
    %c0_2 = arith.constant 0 : index
    %2 = vector.load %arg2[%c0_1, %c0_2] : memref<32x128xbf16, #tpu.memory_space<vmem>>, vector<32x128xbf16>
    %cst = arith.constant dense<0.000000e+00> : vector<16x128xf32>
    %3 = tpu.matmul %1, %2, %cst {dimension_numbers = #tpu.dot_dimension_numbers<[1], [0], [0], [1], [0, 0, 1, 1], [], []>} : vector<16x32xbf16>, vector<32x128xbf16>, vector<16x128xf32> -> vector<16x128xf32>
    %c0_3 = arith.constant 0 : index
    %c0_4 = arith.constant 0 : index
    %4 = vector.load %arg3[%c0_3, %c0_4] : memref<1x128xf32, #tpu.memory_space<vmem>>, vector<1x128xf32>
    %5 = vector.broadcast %4 : vector<1x128xf32> to vector<16x128xf32>
    %6 = arith.addf %3, %5 : vector<16x128xf32>
    %cst_5 = arith.constant 0.000000e+00 : f32
    %7 = vector.broadcast %cst_5 : f32 to vector<16x128xf32>
    %8 = arith.maximumf %6, %7 : vector<16x128xf32>
    %9 = arith.truncf %8 : vector<16x128xf32> to vector<16x128xbf16>
    %c0_6 = arith.constant 0 : index
    %c0_7 = arith.constant 0 : index
    %10 = vector.load %arg4[%c0_6, %c0_7] : memref<128x128xbf16, #tpu.memory_space<vmem>>, vector<128x128xbf16>
    %cst_8 = arith.constant dense<0.000000e+00> : vector<16x128xf32>
    %11 = tpu.matmul %9, %10, %cst_8 {dimension_numbers = #tpu.dot_dimension_numbers<[1], [0], [0], [1], [0, 0, 1, 1], [], []>} : vector<16x128xbf16>, vector<128x128xbf16>, vector<16x128xf32> -> vector<16x128xf32>
    %c0_9 = arith.constant 0 : index
    %c0_10 = arith.constant 0 : index
    %12 = vector.load %arg5[%c0_9, %c0_10] : memref<1x128xf32, #tpu.memory_space<vmem>>, vector<1x128xf32>
    %13 = vector.broadcast %12 : vector<1x128xf32> to vector<16x128xf32>
    %14 = arith.addf %11, %13 : vector<16x128xf32>
    %cst_11 = arith.constant 0.000000e+00 : f32
    %15 = vector.broadcast %cst_11 : f32 to vector<16x128xf32>
    %16 = arith.maximumf %14, %15 : vector<16x128xf32>
    %17 = arith.truncf %16 : vector<16x128xf32> to vector<16x128xbf16>
    %c0_12 = arith.constant 0 : index
    %c0_13 = arith.constant 0 : index
    %18 = vector.load %arg6[%c0_12, %c0_13] : memref<128x128xbf16, #tpu.memory_space<vmem>>, vector<128x128xbf16>
    %cst_14 = arith.constant dense<0.000000e+00> : vector<16x128xf32>
    %19 = tpu.matmul %17, %18, %cst_14 {dimension_numbers = #tpu.dot_dimension_numbers<[1], [0], [0], [1], [0, 0, 1, 1], [], []>} : vector<16x128xbf16>, vector<128x128xbf16>, vector<16x128xf32> -> vector<16x128xf32>
    %c0_15 = arith.constant 0 : index
    %c0_16 = arith.constant 0 : index
    %20 = vector.load %arg7[%c0_15, %c0_16] : memref<1x128xf32, #tpu.memory_space<vmem>>, vector<1x128xf32>
    %21 = vector.broadcast %20 : vector<1x128xf32> to vector<16x128xf32>
    %22 = arith.addf %19, %21 : vector<16x128xf32>
    %c0_17 = arith.constant 0 : index
    %c0_18 = arith.constant 0 : index
    %23 = vector.load %arg8[%c0_17, %c0_18] : memref<16x128xf32, #tpu.memory_space<vmem>>, vector<16x128xf32>
    tpu.vector_store %arg8[%c0_17, %c0_18], %22 {strides = array<i32>} : memref<16x128xf32, #tpu.memory_space<vmem>>, vector<16x128xf32>,
    return
  }
  func.func @transform_0(%arg0: i32) -> (i32, i32) {
    %c0_i32 = arith.constant 0 : i32
    %c0_i32_0 = arith.constant 0 : i32
    return %arg0, %c0_i32 : i32, i32
  }
  func.func @transform_1(%arg0: i32) -> (i32, i32) {
    %c0_i32 = arith.constant 0 : i32
    %c0_i32_0 = arith.constant 0 : i32
    %c0_i32_1 = arith.constant 0 : i32
    return %c0_i32, %c0_i32_0 : i32, i32
  }
  func.func @transform_2(%arg0: i32) -> (i32, i32) {
    %c0_i32 = arith.constant 0 : i32
    %c0_i32_0 = arith.constant 0 : i32
    %c0_i32_1 = arith.constant 0 : i32
    return %c0_i32, %c0_i32_0 : i32, i32
  }
  func.func @transform_3(%arg0: i32) -> (i32, i32) {
    %c0_i32 = arith.constant 0 : i32
    %c0_i32_0 = arith.constant 0 : i32
    %c0_i32_1 = arith.constant 0 : i32
    return %c0_i32, %c0_i32_0 : i32, i32
  }
  func.func @transform_4(%arg0: i32) -> (i32, i32) {
    %c0_i32 = arith.constant 0 : i32
    %c0_i32_0 = arith.constant 0 : i32
    %c0_i32_1 = arith.constant 0 : i32
    return %c0_i32, %c0_i32_0 : i32, i32
  }
  func.func @transform_5(%arg0: i32) -> (i32, i32) {
    %c0_i32 = arith.constant 0 : i32
    %c0_i32_0 = arith.constant 0 : i32
    %c0_i32_1 = arith.constant 0 : i32
    return %c0_i32, %c0_i32_0 : i32, i32
  }
  func.func @transform_6(%arg0: i32) -> (i32, i32) {
    %c0_i32 = arith.constant 0 : i32
    %c0_i32_0 = arith.constant 0 : i32
    %c0_i32_1 = arith.constant 0 : i32
    return %c0_i32, %c0_i32_0 : i32, i32
  }
  func.func @transform_7(%arg0: i32) -> (i32, i32) {
    %c0_i32 = arith.constant 0 : i32
    %c0_i32_0 = arith.constant 0 : i32
    return %arg0, %c0_i32 : i32, i32
  }
}

</mosaic_0001>

<bundles_post_ra>
// kernel: mlp_forward.1
= control target key start
LH: loop header
LB: loop body
LE: loop exit
PB: predicated region body
PF: predicated region fallthrough
CT: control target
= control target key end

     0   :  { %12 = vsyncpa [#allocation3], 0  ;;  %s707_s0 = inlined_call_operand.hbm [shape: f32[16,32], index: 0, kind: input, shape index: {}]   ;;  %s708_s1 = inlined_call_operand.hbm [shape: bf16[32,128], index: 1, kind: input, shape index: {}]   ;;  %s709_s2 = inlined_call_operand.vmem [shape: f32[1,128], index: 2, kind: input, shape index: {}]   ;;  %s710_s3 = inlined_call_operand.hbm [shape: bf16[128,128], index: 3, kind: input, shape index: {}]   ;;  %s711_s4 = inlined_call_operand.vmem [shape: f32[1,128], index: 4, kind: input, shape index: {}]   ;;  %s712_s5 = inlined_call_operand.hbm [shape: bf16[128,128], index: 5, kind: input, shape index: {}]   ;;  %s713_s6 = inlined_call_operand.vmem [shape: f32[1,128], index: 6, kind: input, shape index: {}]   ;;  %s714_s7 = inlined_call_operand.vmem [shape: f32[16,128], index: 7, kind: output, shape index: {}]  }
   0x1   :  { %13 = vsyncpa [#allocation5], 0 }
   0x2   :  { %14 = vsyncpa [#allocation8], 0  ;;  %s597_s24 = smov [#allocation4]  }
   0x3   :  { %s32_s25 = sshll.u32 %s597_s24, 4  ;;  %s33_s25 = int_to_ptr.vmem [resolvable:$true] %s32_s25 }
   0x4   :  { %s519_s26 = scalar_lea.vmem %s33_s25, 256  ;;  %p524_p1 = scmp.lt.s32.totalorder %s33_s25, %s33_s25 }
   0x5   :  { %p520_p0 = scmp.ne.s32.totalorder %s33_s25, %s519_s26  ;;  %p525_p2 = scmp.lt.s32.totalorder %s519_s26, %s519_s26 }
   0x7   :  { %p526_p3 = por %p525_p2, %p524_p1 }
   0x9   :  { %p527_p4 = pnand %p526_p3, %p520_p0 }
   0xb   :  { %530 = shalt.err (!%p527_p4)
}
   0xc   :  { %s598_s27 = smov 64   ;;  %s599_s28 = smov 4  }
   0xd   :  { %38 = dma.hbm_to_vmem [thread:$0]  %s708_s1, 256, %s33_s25, [#allocation5], %s598_s27, %s598_s27, %s599_s28  }
   0xe   :  { %s600_s8 = smov [#allocation2]  }
   0xf   :  { %s20_s9 = sshll.u32 %s600_s8, 4  ;;  %s21_s9 = int_to_ptr.vmem [resolvable:$true] %s20_s9 }
  0x10   :  { %s539_s10 = scalar_lea.vmem %s21_s9, 256  ;;  %p544_p6 = scmp.lt.s32.totalorder %s21_s9, %s21_s9 }
  0x11   :  { %p540_p5 = scmp.ne.s32.totalorder %s21_s9, %s539_s10  ;;  %p545_p7 = scmp.lt.s32.totalorder %s539_s10, %s539_s10 }
  0x13   :  { %p546_p8 = por %p545_p7, %p544_p6 }
  0x15   :  { %p547_p9 = pnand %p546_p8, %p540_p5 }
  0x17   :  { %550 = shalt.err (!%p547_p9)
}
  0x18   :  { %s601_s11 = smov 128   ;;  %s602_s12 = smov 8  }
  0x19   :  { %26 = dma.hbm_to_vmem [thread:$0]  %s707_s0, 256, %s21_s9, [#allocation3], %s601_s11, %s601_s11, %s602_s12  }
  0x1a   :  { %s603_s15 = smov [#allocation6]   ;;  %s604_s17 = smov [#allocation7]  }
  0x1b   :  { %s46_s16 = sshll.u32 %s603_s15, 4  ;;  %s60_s1 = sshll.u32 %s604_s17, 4  ;;  %s47_s16 = int_to_ptr.vmem [resolvable:$true] %s46_s16  ;;  %s61_s1 = int_to_ptr.vmem [resolvable:$true] %s60_s1 }
  0x1c   :  { %s559_s18 = scalar_lea.vmem %s47_s16, 1024  ;;  %p564_p11 = scmp.lt.s32.totalorder %s47_s16, %s47_s16 }
  0x1d   :  { %p560_p10 = scmp.ne.s32.totalorder %s47_s16, %s559_s18  ;;  %p565_p12 = scmp.lt.s32.totalorder %s559_s18, %s559_s18 }
  0x1f   :  { %p566_p13 = por %p565_p12, %p564_p11 }
  0x21   :  { %p567_p0 = pnand %p566_p13, %p560_p10 }
  0x23   :  { %570 = shalt.err (!%p567_p0)
}
  0x24   :  { %52 = dma.hbm_to_vmem [thread:$0]  %s710_s3, 1024, %s47_s16, [#allocation5], %s598_s27, %s598_s27, %s599_s28  }
  0x25   :  { %s579_s0 = scalar_lea.vmem %s61_s1, 1024  ;;  %p584_p2 = scmp.lt.s32.totalorder %s61_s1, %s61_s1 }
  0x26   :  { %p580_p1 = scmp.ne.s32.totalorder %s61_s1, %s579_s0  ;;  %p585_p3 = scmp.lt.s32.totalorder %s579_s0, %s579_s0 }
  0x28   :  { %p586_p4 = por %p585_p3, %p584_p2 }
  0x2a   :  { %p587_p5 = pnand %p586_p4, %p580_p1 }
  0x2c   :  { %590 = shalt.err (!%p587_p5)
}
  0x2d   :  { %66 = dma.hbm_to_vmem [thread:$0]  %s712_s5, 1024, %s61_s1, [#allocation8], %s598_s27, %s598_s27, %s599_s28  }
  0x2e   :  { %591 = dma.done.wait [#allocation3], 256  }
  0x2f   :  { %592 = vsyncadd [#allocation3], 4294967040 }
  0x30   :  { %593 = dma.done.wait [#allocation5], 1280  }
  0x31   :  { %594 = vsyncadd [#allocation5], 4294966016 }
  0x32   :  { %595 = dma.done.wait [#allocation8], 1024  }
  0x33   :  { %596 = vsyncadd [#allocation8], 4294966272  ;;  %v605_v0 = vmov 0.0   ;;  %vm606_vm0 = vmmov 0   ;;  %v493_v1 = vld [vmem:[#allocation4 + $0x8] sm:$0xff]   ;;  %v494_v2 = vld [vmem:[#allocation4] sm:$0xff]  }
  0x34   :  { %435 = vmatprep.subr.bf16.mxu0 %v605_v0  ;;  %439 = vmatprep.mubr.msk.bf16.mxu0 %vm606_vm0, %v605_v0  ;;  %v82_v3 = vld [vmem:[#allocation2] sm:$0xff]  ;;  %v83_v4 = vld [vmem:[#allocation2 + $0x8] sm:$0xff]  ;;  %v495_v5 = vld [vmem:[#allocation6 + $0x38] sm:$0xff]   ;;  %vm108_vm1 = vcmask 261120  }
  0x35   :  { %443 = vmatprep.subr.bf16.mxu1 %v605_v0  ;;  %459 = vmatprep.mubr.msk.bf16.mxu1 %vm606_vm0, %v605_v0  ;;  %v84_v6 = vpack.c.bf16 %v83_v4, %v82_v3  ;;  %v496_v7 = vld [vmem:[#allocation6 + $0x30] sm:$0xff]   ;;  %v497_v8 = vld [vmem:[#allocation6 + $0x28] sm:$0xff]   ;;  %v498_v9 = vld [vmem:[#allocation6 + $0x20] sm:$0xff]  }
  0x36   :  { %436 = vmatpush3.bf16.msra.mxu0 %v493_v1  ;;  %444 = vmatpush3.bf16.msra.mxu1 %v495_v5  ;;  %v499_v10 = vld [vmem:[#allocation6 + $0x18] sm:$0xff]   ;;  %v500_v11 = vld [vmem:[#allocation6 + $0x10] sm:$0xff]   ;;  %v501_v12 = vld [vmem:[#allocation6 + $0x8] sm:$0xff]  }
  0x37   :  { %437 = vmatprep.subr.bf16.mxu0 %v605_v0  ;;  %445 = vmatprep.subr.bf16.mxu1 %v605_v0  ;;  %v502_v13 = vld [vmem:[#allocation6] sm:$0xff]   ;;  %v503_v14 = vld [vmem:[#allocation7 + $0x38] sm:$0xff]   ;;  %v504_v15 = vld [vmem:[#allocation7 + $0x30] sm:$0xff]  }
  0x38   :  { %v505_v16 = vld [vmem:[#allocation7 + $0x28] sm:$0xff]   ;;  %v506_v17 = vld [vmem:[#allocation7 + $0x20] sm:$0xff]   ;;  %v507_v18 = vld [vmem:[#allocation7 + $0x18] sm:$0xff]  }
  0x39   :  { %v392_v19 = vld [vmem:[%s709_s2] ss:$0 sm:$0xff]  ;;  %v508_v29 = vld [vmem:[#allocation7 + $0x10] sm:$0xff]   ;;  %v509_v30 = vld [vmem:[#allocation7 + $0x8] sm:$0xff]  }
  0x3a   :  { %438 = vmatpush3.bf16.msra.mxu0 %v494_v2  ;;  %446 = vmatpush3.bf16.msra.mxu1 %v496_v7  ;;  %v510_v31 = vld [vmem:[#allocation7] sm:$0xff]  }
  0x3b   :  { %463 = vmatprep.subr.bf16.mxu0 %v605_v0  ;;  %447 = vmatprep.subr.bf16.mxu1 %v605_v0  ;;  %v396_v32 = vld [vmem:[%s711_s4] ss:$0 sm:$0xff] }
  0x3c   :  { %v405_v42 = vld [vmem:[%s713_s6] ss:$0 sm:$0xff] }
  0x3d   :  { %440 = vmatmul.mubr.msk.bf16.vlgmr.msra.gmra.mxu0 %vm108_vm1, %v84_v6 }
  0x3e   :  { %479 = vmatprep.mubr.msk.bf16.mxu0 %vm606_vm0, %v605_v0  ;;  %448 = vmatpush3.bf16.msra.mxu1 %v497_v8 }
  0x3f   :  { %449 = vmatprep.subr.bf16.mxu1 %v605_v0  ;;  %464 = vmatpush3.bf16.msra.mxu0 %v503_v14 }
  0x40   :  { %465 = vmatprep.subr.bf16.mxu0 %v605_v0 }
  0x42   :  { %450 = vmatpush3.bf16.msra.mxu1 %v498_v9 }
  0x43   :  { %451 = vmatprep.subr.bf16.mxu1 %v605_v0  ;;  %466 = vmatpush3.bf16.msra.mxu0 %v504_v15 }
  0x44   :  { %467 = vmatprep.subr.bf16.mxu0 %v605_v0 }
  0x46   :  { %452 = vmatpush3.bf16.msra.mxu1 %v499_v10 }
  0x47   :  { %453 = vmatprep.subr.bf16.mxu1 %v605_v0  ;;  %468 = vmatpush3.bf16.msra.mxu0 %v505_v16 }
  0x48   :  { %469 = vmatprep.subr.bf16.mxu0 %v605_v0 }
  0x4a   :  { %454 = vmatpush3.bf16.msra.mxu1 %v500_v11 }
  0x4b   :  { %455 = vmatprep.subr.bf16.mxu1 %v605_v0  ;;  %470 = vmatpush3.bf16.msra.mxu0 %v506_v17 }
  0x4c   :  { %471 = vmatprep.subr.bf16.mxu0 %v605_v0 }
  0x4e   :  { %456 = vmatpush3.bf16.msra.mxu1 %v501_v12 }
  0x4f   :  { %457 = vmatprep.subr.bf16.mxu1 %v605_v0  ;;  %472 = vmatpush3.bf16.msra.mxu0 %v507_v18 }
  0x50   :  { %473 = vmatprep.subr.bf16.mxu0 %v605_v0 }
  0x52   :  { %458 = vmatpush3.bf16.msra.mxu1 %v502_v13 }
  0x53   :  { %474 = vmatpush3.bf16.msra.mxu0 %v508_v29 }
  0x54   :  { %475 = vmatprep.subr.bf16.mxu0 %v605_v0 }
  0x57   :  { %476 = vmatpush3.bf16.msra.mxu0 %v509_v30 }
  0x58   :  { %477 = vmatprep.subr.bf16.mxu0 %v605_v0 }
  0x5b   :  { %478 = vmatpush3.bf16.msra.mxu0 %v510_v31 }
  0xfd   :  { %v146_v20 = vpop.f32.mrf.mxu0 }
  0xfe   :  { %v147_v22 = vadd.f32 %v392_v19, %v146_v20 }
  0xff   :  { %v441_v21 = vpop.f32.mrf.mxu0 }
 0x100   :  { %v153_v26 = vmax.f32 %v147_v22, 0.0 }
 0x101   :  { %v149_v23 = vpop.f32.mrf.mxu0 }
 0x102   :  { %v150_v24 = vadd.f32 %v392_v19, %v149_v23 }
 0x103   :  { %v442_v25 = vpop.f32.mrf.mxu0 }
 0x104   :  { %v154_v27 = vmax.f32 %v150_v24, 0.0 }
 0x106   :  { %v155_v28 = vpack.c.bf16 %v154_v27, %v153_v26 }
 0x108   :  { %460 = vmatmul.mubr.bf16.vlgmr.msra.gmra.mxu1 %v155_v28 }
 0x1c8   :  { %v261_v33 = vpop.f32.mrf.mxu1 }
 0x1c9   :  { %v262_v35 = vadd.f32 %v396_v32, %v261_v33 }
 0x1ca   :  { %v461_v34 = vpop.f32.mrf.mxu1 }
 0x1cb   :  { %v268_v39 = vmax.f32 %v262_v35, 0.0 }
 0x1cc   :  { %v264_v36 = vpop.f32.mrf.mxu1 }
 0x1cd   :  { %v265_v37 = vadd.f32 %v396_v32, %v264_v36 }
 0x1ce   :  { %v462_v38 = vpop.f32.mrf.mxu1 }
 0x1cf   :  { %v269_v40 = vmax.f32 %v265_v37, 0.0 }
 0x1d1   :  { %v270_v41 = vpack.c.bf16 %v269_v40, %v268_v39 }
 0x1d3   :  { %480 = vmatmul.mubr.bf16.vlgmr.msra.gmra.mxu0 %v270_v41 }
 0x293   :  { %v376_v43 = vpop.f32.mrf.mxu0 }
 0x294   :  { %v377_v44 = vadd.f32 %v405_v42, %v376_v43 }
 0x295   :  { %v481_v45 = vpop.f32.mrf.mxu0 }
 0x296   :  { %383 = vst [vmem:[%s714_s7] sm:$0xff] %v377_v44 }
 0x297   :  { %v379_v46 = vpop.f32.mrf.mxu0 }
 0x298   :  { %v380_v47 = vadd.f32 %v405_v42, %v379_v46 }
 0x299   :  { %v482_v48 = vpop.f32.mrf.mxu0 }
 0x29a   :  { %384 = vst [vmem:[%s714_s7 + $0x8] sm:$0xff] %v380_v47 }
 0x29b   :  { %389 = vsyncpa [#allocation3], 1 }
 0x29c   :  { %390 = vsyncpa [#allocation5], 1 }
 0x29d   :  { %391 = vsyncpa [#allocation8], 1 }

</bundles_post_ra>
